<compile_context>
chip_gen: v7x
topology: tpu7x:2x2x1
jax: 0.10.0
libtpu: 0.0.40
codegen_flags: <defaults>
</compile_context>

<pallas_src>
import jax
import jax.numpy as jnp
from jax import lax
from jax.experimental import pallas as pl
from jax.experimental.pallas import tpu as pltpu


def _param_ce_kernel(logits_ref, targets_ref, params_ref, out_ref):
    # Upcast after the (native-dtype) DMA.
    x = logits_ref[...].astype(jnp.float32)          # [TB, C]
    dy = params_ref[0:1, :]                          # [1, C] f32
    ly = params_ref[1:2, :]                          # [1, C] f32

    gate = jax.nn.sigmoid(6.0 * dy)                  # [1, C]
    x = x * gate + ly                                # [TB, C]

    # Stable log-softmax pieces; reuse xm for both exp-sum and target pick.
    m = jnp.max(x, axis=-1, keepdims=True)           # [TB, 1]
    xm = x - m                                       # [TB, C]
    lse_rel = jnp.log(jnp.sum(jnp.exp(xm), axis=-1, keepdims=True))   # [TB, 1]

    # Gather x[i, t_i] - m_i via one-hot select (no dynamic gather on TPU).
    col_ids = lax.broadcasted_iota(jnp.int32, xm.shape, 1)            # [TB, C]
    tgt = targets_ref[...]                                            # [TB, 1]
    picked_rel = jnp.sum(jnp.where(col_ids == tgt, xm, 0.0),
                         axis=-1, keepdims=True)                      # [TB, 1]

    # Per-row NLL: (m + lse_rel) - (picked_rel + m) = lse_rel - picked_rel.
    out_ref[...] = lse_rel - picked_rel


def param_cross_entropy(logits, targets, params, *, max_block_rows=None):
    """logits: [B, C] (any float dtype), targets: [B] int, params: [2, C] -> scalar f32."""
    B, C = logits.shape
    targets2d = targets.astype(jnp.int32).reshape(B, 1)
    params_f32 = params.astype(jnp.float32)          # tiny [2, C]

    # Pick the batch tile from a conservative VMEM budget:
    #   2 double-buffered native-dtype input tiles + ~3 f32 [TB, C] temporaries.
    in_bytes = jnp.dtype(logits.dtype).itemsize
    budget_bytes = 24 * 1024 * 1024
    per_row_bytes = C * (2 * in_bytes + 3 * 4)
    tb_cap = max(8, budget_bytes // per_row_bytes)
    if max_block_rows is not None:
        tb_cap = min(tb_cap, max_block_rows)
    if B <= tb_cap:
        tb = B                                      # single tile: block == full batch dim
    else:
        tb = max(8, min(1024, (tb_cap // 8) * 8))   # multiple of 8 sublanes
    grid = (pl.cdiv(B, tb),)

    per_row_nll = pl.pallas_call(
        _param_ce_kernel,
        out_shape=jax.ShapeDtypeStruct((B, 1), jnp.float32),
        grid_spec=pltpu.PrefetchScalarGridSpec(
            num_scalar_prefetch=0,
            grid=grid,
            in_specs=[
                pl.BlockSpec((tb, C), lambda i: (i, 0)),   # logits tile (native dtype)
                pl.BlockSpec((tb, 1), lambda i: (i, 0)),   # targets tile
                pl.BlockSpec((2, C), lambda i: (0, 0)),    # params, resident
            ],
            out_specs=pl.BlockSpec((tb, 1), lambda i: (i, 0)),
        ),
        compiler_params=pltpu.CompilerParams(
            dimension_semantics=("parallel",),      # independent batch tiles (v7x megacore)
            vmem_limit_bytes=48 * 1024 * 1024,
        ),
    )(logits, targets2d, params_f32)

    # Tiny final reduction in XLA; divide by the true batch size once.
    return jnp.sum(per_row_nll) / B


def _reference(logits, targets, params):
    dy, ly = params[0].astype(jnp.float32), params[1].astype(jnp.float32)
    x = logits.astype(jnp.float32) * jax.nn.sigmoid(6.0 * dy) + ly
    logp = jax.nn.log_softmax(x, axis=-1)
    nll = -jnp.take_along_axis(logp, targets[:, None].astype(jnp.int32), axis=-1)
    return jnp.mean(nll)


if __name__ == "__main__":
    key = jax.random.PRNGKey(0)

    # Case 1: small f32, single tile.
    k1, k2, k3 = jax.random.split(key, 3)
    B, C = 8, 32
    logits = jax.random.normal(k1, (B, C), dtype=jnp.float32)
    targets = jax.random.randint(k2, (B,), 0, C, dtype=jnp.int32)
    params = jax.random.normal(k3, (2, C), dtype=jnp.float32) * 0.5
    loss = param_cross_entropy(logits, targets, params)
    jax.block_until_ready(loss)
    ref = _reference(logits, targets, params)
    assert jnp.allclose(loss, ref, atol=1e-5, rtol=1e-5), (loss, ref)

    # Case 2: multi-tile grid with a partial last tile (B % TB != 0).
    k4, k5, k6 = jax.random.split(jax.random.PRNGKey(1), 3)
    B2, C2 = 40, 256
    logits2 = jax.random.normal(k4, (B2, C2), dtype=jnp.float32)
    targets2 = jax.random.randint(k5, (B2,), 0, C2, dtype=jnp.int32)
    params2 = jax.random.normal(k6, (2, C2), dtype=jnp.float32) * 0.5
    loss2 = param_cross_entropy(logits2, targets2, params2, max_block_rows=16)
    jax.block_until_ready(loss2)
    ref2 = _reference(logits2, targets2, params2)
    assert jnp.allclose(loss2, ref2, atol=1e-5, rtol=1e-5), (loss2, ref2)

    # Case 3: bf16 logits DMA'd natively, upcast inside the kernel.
    logits3 = logits2.astype(jnp.bfloat16)
    loss3 = param_cross_entropy(logits3, targets2, params2, max_block_rows=16)
    jax.block_until_ready(loss3)
    ref3 = _reference(logits3, targets2, params2)
    assert jnp.allclose(loss3, ref3, atol=1e-4, rtol=1e-4), (loss3, ref3)

    print("KERNEL_OK")
</pallas_src>

<mosaic_0001>
module attributes {stable_mosaic.version = 11 : i64} {
  func.func @_param_ce_kernel(%arg0: i32, %arg1: memref<8x32xf32, #tpu.memory_space<vmem>>, %arg2: memref<8x1xi32, #tpu.memory_space<vmem>>, %arg3: memref<2x32xf32, #tpu.memory_space<vmem>>, %arg4: memref<8x1xf32, #tpu.memory_space<vmem>>) attributes {dimension_semantics = [#tpu.dimension_semantics<parallel>], iteration_bounds = array<i64: 1>, scalar_prefetch = 0 : i64, scratch_operands = 0 : i64, tpu.core_type = #tpu.core_type<tc>, window_params = [{transform_indices = @transform_0, window_bounds = array<i64: 8, 32>}, {transform_indices = @transform_1, window_bounds = array<i64: 8, 1>}, {pipeline_mode = #tpu.pipeline_mode<synchronous>, transform_indices = @transform_2, window_bounds = array<i64: 2, 32>}, {transform_indices = @transform_3, window_bounds = array<i64: 8, 1>}]} {
    %c0 = arith.constant 0 : index
    %c0_0 = arith.constant 0 : index
    %0 = vector.load %arg1[%c0, %c0_0] : memref<8x32xf32, #tpu.memory_space<vmem>>, vector<8x32xf32>
    %c0_1 = arith.constant 0 : index
    %c0_2 = arith.constant 0 : index
    %1 = vector.load %arg3[%c0_1, %c0_2] : memref<2x32xf32, #tpu.memory_space<vmem>>, vector<1x32xf32>
    %c1 = arith.constant 1 : index
    %c0_3 = arith.constant 0 : index
    %2 = vector.load %arg3[%c1, %c0_3] : memref<2x32xf32, #tpu.memory_space<vmem>>, vector<1x32xf32>
    %cst = arith.constant 6.000000e+00 : f32
    %3 = vector.broadcast %cst : f32 to vector<1x32xf32>
    %4 = arith.mulf %3, %1 : vector<1x32xf32>
    %5 = arith.negf %4 : vector<1x32xf32>
    %6 = math.exp %5 : vector<1x32xf32>
    %cst_4 = arith.constant 1.000000e+00 : f32
    %7 = vector.broadcast %cst_4 : f32 to vector<1x32xf32>
    %8 = arith.addf %7, %6 : vector<1x32xf32>
    %9 = arith.divf %7, %8 : vector<1x32xf32>
    %10 = vector.broadcast %9 : vector<1x32xf32> to vector<8x32xf32>
    %11 = arith.mulf %0, %10 : vector<8x32xf32>
    %12 = vector.broadcast %2 : vector<1x32xf32> to vector<8x32xf32>
    %13 = arith.addf %11, %12 : vector<8x32xf32>
    %cst_5 = arith.constant dense<0xFF800000> : vector<8xf32>
    %14 = vector.multi_reduction <maximumf>, %13, %cst_5 [1] : vector<8x32xf32> to vector<8xf32>
    %15 = vector.shape_cast %14 : vector<8xf32> to vector<8x1xf32>
    %16 = vector.broadcast %15 : vector<8x1xf32> to vector<8x32xf32>
    %17 = arith.subf %13, %16 : vector<8x32xf32>
    %18 = math.exp %17 : vector<8x32xf32>
    %cst_6 = arith.constant dense<0.000000e+00> : vector<8xf32>
    %19 = vector.multi_reduction <add>, %18, %cst_6 [1] : vector<8x32xf32> to vector<8xf32>
    %20 = vector.shape_cast %19 : vector<8xf32> to vector<8x1xf32>
    %21 = math.log %20 : vector<8x1xf32>
    %22 = tpu.iota {dimensions = array<i32: 1>} : vector<8x32xi32>
    %c0_7 = arith.constant 0 : index
    %c0_8 = arith.constant 0 : index
    %23 = vector.load %arg2[%c0_7, %c0_8] : memref<8x1xi32, #tpu.memory_space<vmem>>, vector<8x1xi32>
    %24 = vector.broadcast %23 : vector<8x1xi32> to vector<8x32xi32>
    %25 = arith.cmpi eq, %22, %24 : vector<8x32xi32>
    %cst_9 = arith.constant 0.000000e+00 : f32
    %26 = vector.broadcast %cst_9 : f32 to vector<8x32xf32>
    %27 = arith.select %25, %17, %26 : vector<8x32xi1>, vector<8x32xf32>
    %cst_10 = arith.constant dense<0.000000e+00> : vector<8xf32>
    %28 = vector.multi_reduction <add>, %27, %cst_10 [1] : vector<8x32xf32> to vector<8xf32>
    %29 = vector.shape_cast %28 : vector<8xf32> to vector<8x1xf32>
    %30 = arith.subf %21, %29 : vector<8x1xf32>
    %c0_11 = arith.constant 0 : index
    %c0_12 = arith.constant 0 : index
    %31 = vector.load %arg4[%c0_11, %c0_12] : memref<8x1xf32, #tpu.memory_space<vmem>>, vector<8x1xf32>
    tpu.vector_store %arg4[%c0_11, %c0_12], %30 {strides = array<i32>} : memref<8x1xf32, #tpu.memory_space<vmem>>, vector<8x1xf32>,
    return
  }
  func.func @transform_0(%arg0: i32) -> (i32, i32) {
    %c0_i32 = arith.constant 0 : i32
    %c0_i32_0 = arith.constant 0 : i32
    return %arg0, %c0_i32 : i32, i32
  }
  func.func @transform_1(%arg0: i32) -> (i32, i32) {
    %c0_i32 = arith.constant 0 : i32
    %c0_i32_0 = arith.constant 0 : i32
    return %arg0, %c0_i32 : i32, i32
  }
  func.func @transform_2(%arg0: i32) -> (i32, i32) {
    %c0_i32 = arith.constant 0 : i32
    %c0_i32_0 = arith.constant 0 : i32
    %c0_i32_1 = arith.constant 0 : i32
    return %c0_i32, %c0_i32_0 : i32, i32
  }
  func.func @transform_3(%arg0: i32) -> (i32, i32) {
    %c0_i32 = arith.constant 0 : i32
    %c0_i32_0 = arith.constant 0 : i32
    return %arg0, %c0_i32 : i32, i32
  }
}

</mosaic_0001>

<bundles_post_ra>
// kernel: tpu_custom_call.1
= control target key start
LH: loop header
LB: loop body
LE: loop exit
PB: predicated region body
PF: predicated region fallthrough
CT: control target
= control target key end

     0   :  { %v76_v1 = vmov 0   ;;  %v24_v6 = vlaneseq  ;;  %vm34_vm0 = vcmask 261120   ;;  %vm58_vm2 = vcmask 7168   ;;  %s115_s2 = inlined_call_operand.vmem [shape: f32[2,32], index: 2, kind: input, shape index: {}]   ;;  %s116_s0 = inlined_call_operand.vmem [shape: f32[8,32], index: 0, kind: input, shape index: {}]   ;;  %s117_s1 = inlined_call_operand.vmem [shape: s32[8,1], index: 1, kind: input, shape index: {}]   ;;  %s118_s3 = inlined_call_operand.vmem [shape: f32[8,1], index: 3, kind: output, shape index: {}]  }
   0x1   :  { %v15_v0 = vld [vmem:[%s115_s2] sm:$0x1]  ;;  %67 = vset.pattern.permute.xlu0 %v76_v1  ;;  %v65_v12 = vld [vmem:[%s115_s2 + $0x1] ss:$0 sm:$0xff] }
   0x2   :  { %v64_v2 = vmul.f32 -6.0, %v15_v0  ;;  %v25_v7 = vshrl.u32 %v24_v6, 7  ;;  %v14_v10 = vld [vmem:[%s116_s0] sm:$0xff]  ;;  %v47_v20 = vand.u32 127, %v24_v6 }
   0x3   :  { %v48_v16 = vld [vmem:[%s117_s1] sm:$0xff] }
   0x4   :  { %v19_v3 = vmul.f32 1.442695, %v64_v2  ;;  %v26_v8 = vsub.s32 0, %v25_v7 }
   0x6   :  { %68 = vpow2.f32 %v19_v3 }
  0x10   :  { %v69_v4 = vpop.eup %68 }
  0x11   :  { %v21_v5 = vadd.f32 1.0, %v69_v4 }
  0x13   :  { %70 = vrcp.f32 %v21_v5 }
  0x1d   :  { %v71_v9 = vpop.eup %70 }
  0x1e   :  { %v27_v11 = vrot.slane %v71_v9, %v26_v8 }
  0x20   :  { %v28_v13 = vmul.f32 %v27_v11, %v14_v10 }
  0x22   :  { %v33_v14 = vadd.f32 %v65_v12, %v28_v13 }
  0x24   :  { %v35_v15 = vsel %vm34_vm0, %v33_v14, -inf }
  0x25   :  { %36 = vmax.xlane.f32.xlu0 %v35_v15 }
  0x3b   :  { %50 = vperm.xlu0 %67, %v48_v16  }
  0xb2   :  { %v37_v17 = vpop.xlane.xlu0 %36 }
  0xb3   :  { %v38_v18 = vsub.f32 %v33_v14, %v37_v17 }
  0xb5   :  { %v39_v19 = vmul.f32 1.442695, %v38_v18 }
  0xb7   :  { %72 = vpow2.f32 %v39_v19 }
  0xba   :  { %v51_v21 = vpop.permute.xlu0 %50 }
  0xbb   :  { %vm52_vm1 = vcmp.eq.s32.totalorder %v47_v20, %v51_v21 }
  0xbc   :  { %v53_v24 = vsel %vm52_vm1, %v38_v18, 0.0 }
  0xbd   :  { %v54_v25 = vsel %vm34_vm0, %v53_v24, 0.0 }
  0xc1   :  { %v73_v22 = vpop.eup %72 }
  0xc2   :  { %v41_v23 = vsel %vm34_vm0, %v73_v22, 0.0 }
  0xc3   :  { %42 = vadd.xlane.f32.xlu1 %v41_v23 }
  0xc7   :  { %55 = vadd.xlane.f32.xlu1 %v54_v25 }
 0x150   :  { %v43_v26 = vpop.xlane.xlu1 %42 }
 0x151   :  { %74 = vlog2.f32 %v43_v26 }
 0x154   :  { %v56_v29 = vpop.xlane.xlu1 %55 }
 0x15b   :  { %v75_v27 = vpop.eup %74 }
 0x15c   :  { %v45_v28 = vmul.f32 0.6931472, %v75_v27 }
 0x15e   :  { %v57_v30 = vsub.f32 %v45_v28, %v56_v29 }
 0x160   :  { %59 = vst.msk [vmem:[%s118_s3] sm:$0xff] %vm58_vm2, %v57_v30 }

</bundles_post_ra>
